<compile_context>
chip_gen: v7x
topology: tpu7x:2x2x1
jax: 0.10.0
libtpu: 0.0.40
codegen_flags: <defaults>
</compile_context>

<pallas_src>
import functools

import jax
import jax.numpy as jnp
from jax.experimental import pallas as pl
from jax.experimental.pallas import tpu as pltpu


_LANE_CANDIDATES = (512, 256, 128)      # lane-dense widths (multiples of 128, even)
_BLOCK_BYTE_BUDGET = 4 * 1024 * 1024    # ~4 MiB per block, dtype independent
_MIN_SPLIT_BLOCK_BYTES = 512 * 1024     # never shrink blocks below this for megacore
_SMALL_INPUT_ELEMS = 1 << 16            # below this, plain jnp beats a kernel launch


def _affine_kernel(a_ref, b_ref, x_ref, o_ref, *, mul_then_add):
    """Per-coordinate affine map on a lane-dense tile.

    norm   (mul_then_add=False): out = (x + b) * a   with b = -mean, a = 1/std
    denorm (mul_then_add=True):  out = x * a + b     with a = std,   b = mean

    a_ref / b_ref are (1, lanes) f32 rows holding the alternating x/y
    constants (the flat stream is x0, y0, x1, y1, ...), hoisted out of the
    per-tile body so the kernel is just mul+add per element.
    """
    x = x_ref[...].astype(jnp.float32)
    a = a_ref[...]
    b = b_ref[...]
    out = x * a + b if mul_then_add else (x + b) * a
    o_ref[...] = out.astype(o_ref.dtype)


def _affine_jnp(x, *, ax, ay, bx, by, mul_then_add, out_dtype):
    """Single fused XLA elementwise pass (tiny / misaligned / non-float inputs)."""
    a = jnp.asarray([ax, ay], jnp.float32)
    b = jnp.asarray([bx, by], jnp.float32)
    xf = x.astype(jnp.float32)
    out = xf * a + b if mul_then_add else (xf + b) * a
    return out.astype(out_dtype)


def _affine(x, *, ax, ay, bx, by, mul_then_add,
            block_bytes=_BLOCK_BYTE_BUDGET,
            small_threshold=_SMALL_INPUT_ELEMS):
    """Apply the per-coordinate affine map to x[..., 2]."""
    orig_shape = x.shape
    orig_dtype = x.dtype
    assert orig_shape[-1] == 2, "last axis must be (loc_x, loc_y)"
    total = x.size

    # Non-floating inputs promote to float32 (same as the torch module, where
    # int / float32-stat arithmetic yields float32).
    floating = jnp.issubdtype(orig_dtype, jnp.floating)
    out_dtype = orig_dtype if floating else jnp.float32

    jnp_path = functools.partial(
        _affine_jnp, x, ax=ax, ay=ay, bx=bx, by=by,
        mul_then_add=mul_then_add, out_dtype=out_dtype)

    # Tiny trajectories: kernel launch + single-step grid overhead dominates.
    if total < small_threshold or not floating:
        return jnp_path()

    # Lane-dense width that divides the flat element count (free reshape,
    # no pad before the kernel, no slice after it).
    lanes = next((c for c in _LANE_CANDIDATES if total % c == 0), None)
    if lanes is None:
        # Misaligned flat length: pad+kernel+slice would cost two extra full
        # HBM passes; a fused XLA elementwise op is single-pass and already at
        # the HBM roofline for this trivial affine.
        # TODO(synk): in-kernel masked tail store if this path ever gets hot.
        return jnp_path()

    itemsize = jnp.dtype(orig_dtype).itemsize
    rows = total // lanes
    x2d = x.reshape(rows, lanes)

    # Sublane tile multiple for this dtype (8 f32, 16 bf16).
    sub = 8 * max(1, 4 // itemsize)

    # Byte-budget block: ~4 MiB per block regardless of wire dtype.
    budget_rows = max(sub, (block_bytes // (lanes * itemsize)) // sub * sub)

    # v7x megacore: aim for >= ~4 grid steps on large inputs (the "parallel"
    # axis is what shards across the 2 TensorCores), but never shrink blocks
    # below _MIN_SPLIT_BLOCK_BYTES just for that.
    quarter_rows = ((pl.cdiv(rows, 4) + sub - 1) // sub) * sub
    if quarter_rows * lanes * itemsize >= _MIN_SPLIT_BLOCK_BYTES:
        budget_rows = min(budget_rows, quarter_rows)

    br = min(budget_rows, rows)            # multiple of `sub` unless br == rows
    grid = (pl.cdiv(rows, br),)            # partial trailing block is masked by Pallas

    # Hoisted per-lane affine constants: (1, lanes) rows, pattern [cx, cy, ...].
    a_row = jnp.tile(jnp.asarray([ax, ay], jnp.float32), lanes // 2).reshape(1, lanes)
    b_row = jnp.tile(jnp.asarray([bx, by], jnp.float32), lanes // 2).reshape(1, lanes)

    kernel = functools.partial(_affine_kernel, mul_then_add=mul_then_add)

    out2d = pl.pallas_call(
        kernel,
        out_shape=jax.ShapeDtypeStruct((rows, lanes), out_dtype),
        grid=grid,
        in_specs=[
            pl.BlockSpec((1, lanes), lambda i: (0, 0)),     # a row (resident)
            pl.BlockSpec((1, lanes), lambda i: (0, 0)),     # b row (resident)
            pl.BlockSpec((br, lanes), lambda i: (i, 0)),    # x tile
        ],
        out_specs=pl.BlockSpec((br, lanes), lambda i: (i, 0)),
        compiler_params=pltpu.CompilerParams(
            dimension_semantics=("parallel",),
            vmem_limit_bytes=32 * 1024 * 1024,
        ),
        cost_estimate=pl.CostEstimate(
            flops=2 * total,
            transcendentals=0,
            bytes_accessed=2 * total * itemsize,
        ),
        # TODO(synk): offer input_output_aliases={2: 0} when the caller can
        # donate x (saves the output HBM allocation; needs a donated buffer to
        # avoid a defensive copy).
    )(a_row, b_row, x2d)

    return out2d.reshape(orig_shape)


class NormalizeLoc:
    """JAX/Pallas counterpart of the PyTorch Normalize_loc module."""

    def __init__(self, loc_x_mean, loc_y_mean, loc_x_std, loc_y_std):
        self.loc_x_mean = float(loc_x_mean)
        self.loc_y_mean = float(loc_y_mean)
        self.loc_x_std = float(loc_x_std)
        self.loc_y_std = float(loc_y_std)
        # For parity with the torch module / reference checks.
        self.loc_mean = jnp.asarray([self.loc_x_mean, self.loc_y_mean], jnp.float32)
        self.loc_std = jnp.asarray([self.loc_x_std, self.loc_y_std], jnp.float32)
        # Compile-time affine constants (exact host-side reciprocal: no
        # in-kernel divide, no approx-reciprocal accuracy loss).
        self._norm_consts = dict(
            ax=1.0 / self.loc_x_std,
            ay=1.0 / self.loc_y_std,
            bx=-self.loc_x_mean,
            by=-self.loc_y_mean,
            mul_then_add=False,          # (x - mean) * (1/std)
        )
        self._denorm_consts = dict(
            ax=self.loc_x_std,
            ay=self.loc_y_std,
            bx=self.loc_x_mean,
            by=self.loc_y_mean,
            mul_then_add=True,           # x * std + mean
        )

    def __call__(self, x, mode, *,
                 block_bytes=_BLOCK_BYTE_BUDGET,
                 small_threshold=_SMALL_INPUT_ELEMS):
        if mode == "norm":
            return _affine(x, block_bytes=block_bytes,
                           small_threshold=small_threshold, **self._norm_consts)
        if mode == "denorm":
            return _affine(x, block_bytes=block_bytes,
                           small_threshold=small_threshold, **self._denorm_consts)
        return x  # matches PyTorch: unknown mode -> passthrough


if __name__ == "__main__":
    key = jax.random.PRNGKey(0)

    # Deterministic dataset-style statistics.
    loc_x_mean, loc_y_mean = 116.40, 39.90
    loc_x_std, loc_y_std = 0.12, 0.08
    module = NormalizeLoc(loc_x_mean, loc_y_mean, loc_x_std, loc_y_std)
    loc_mean, loc_std = module.loc_mean, module.loc_std

    # (shape, dtype, block_bytes, small_threshold)
    # Case 1: tiny trajectory batch -> fused-jnp shortcut.
    # Case 2: f32 kernel path, small block budget forces a 3-step grid with a
    #         masked partial trailing block (rows=40, br=16).
    # Case 3: bf16 on the wire (native-dtype path), single full block.
    # Case 4: misaligned flat length (not a multiple of 128) -> jnp fallback.
    cases = [
        ((2, 8, 2), jnp.float32, _BLOCK_BYTE_BUDGET, _SMALL_INPUT_ELEMS),
        ((40, 256, 2), jnp.float32, 16 * 512 * 4, 0),
        ((16, 256, 2), jnp.bfloat16, _BLOCK_BYTE_BUDGET, 0),
        ((5, 13, 2), jnp.float32, _BLOCK_BYTE_BUDGET, 0),
    ]

    for shape, dtype, bb, st in cases:
        key, sub = jax.random.split(key)
        noise = jax.random.normal(sub, shape, dtype=jnp.float32)
        x = (noise * loc_std + loc_mean).astype(dtype)

        x_norm = module(x, "norm", block_bytes=bb, small_threshold=st)
        x_denorm = module(x_norm, "denorm", block_bytes=bb, small_threshold=st)
        jax.block_until_ready(x_norm)
        jax.block_until_ready(x_denorm)

        assert x_norm.shape == shape and x_norm.dtype == dtype
        assert x_denorm.shape == shape and x_denorm.dtype == dtype

        xf = x.astype(jnp.float32)
        ref_norm = (xf - loc_mean) / loc_std
        ref_denorm = ref_norm * loc_std + loc_mean

        if dtype == jnp.float32:
            assert jnp.allclose(x_norm, ref_norm, atol=1e-5, rtol=1e-5)
            assert jnp.allclose(x_denorm, ref_denorm, atol=1e-4, rtol=1e-5)
            assert jnp.allclose(x_denorm, xf, atol=1e-4, rtol=1e-5)
        else:  # bf16 wire precision
            assert jnp.allclose(
                x_norm.astype(jnp.float32), ref_norm, atol=5e-2, rtol=5e-2
            )
            assert jnp.allclose(
                x_denorm.astype(jnp.float32), ref_denorm, atol=5e-1, rtol=1e-2
            )

    # Unknown mode -> passthrough (matches PyTorch).
    probe = jnp.ones((2, 8, 2), jnp.float32)
    assert module(probe, "other") is probe

    print("KERNEL_OK")
</pallas_src>

<mosaic_0001>
module attributes {stable_mosaic.version = 11 : i64} {
  func.func @_affine_kernel(%arg0: i32, %arg1: memref<1x512xf32, #tpu.memory_space<vmem>>, %arg2: memref<1x512xf32, #tpu.memory_space<vmem>>, %arg3: memref<16x512xf32, #tpu.memory_space<vmem>>, %arg4: memref<16x512xf32, #tpu.memory_space<vmem>>) attributes {dimension_semantics = [#tpu.dimension_semantics<parallel>], iteration_bounds = array<i64: 3>, scalar_prefetch = 0 : i64, scratch_operands = 0 : i64, tpu.core_type = #tpu.core_type<tc>, window_params = [{pipeline_mode = #tpu.pipeline_mode<synchronous>, transform_indices = @transform_0, window_bounds = array<i64: 1, 512>}, {pipeline_mode = #tpu.pipeline_mode<synchronous>, transform_indices = @transform_1, window_bounds = array<i64: 1, 512>}, {transform_indices = @transform_2, window_bounds = array<i64: 16, 512>}, {transform_indices = @transform_3, window_bounds = array<i64: 16, 512>}]} {
    %c0 = arith.constant 0 : index
    %c0_0 = arith.constant 0 : index
    %0 = vector.load %arg3[%c0, %c0_0] : memref<16x512xf32, #tpu.memory_space<vmem>>, vector<16x512xf32>
    %c0_1 = arith.constant 0 : index
    %c0_2 = arith.constant 0 : index
    %1 = vector.load %arg1[%c0_1, %c0_2] : memref<1x512xf32, #tpu.memory_space<vmem>>, vector<1x512xf32>
    %c0_3 = arith.constant 0 : index
    %c0_4 = arith.constant 0 : index
    %2 = vector.load %arg2[%c0_3, %c0_4] : memref<1x512xf32, #tpu.memory_space<vmem>>, vector<1x512xf32>
    %3 = vector.broadcast %2 : vector<1x512xf32> to vector<16x512xf32>
    %4 = arith.addf %0, %3 : vector<16x512xf32>
    %5 = vector.broadcast %1 : vector<1x512xf32> to vector<16x512xf32>
    %6 = arith.mulf %4, %5 : vector<16x512xf32>
    %c0_5 = arith.constant 0 : index
    %c0_6 = arith.constant 0 : index
    %7 = vector.load %arg4[%c0_5, %c0_6] : memref<16x512xf32, #tpu.memory_space<vmem>>, vector<16x512xf32>
    tpu.vector_store %arg4[%c0_5, %c0_6], %6 {strides = array<i32>} : memref<16x512xf32, #tpu.memory_space<vmem>>, vector<16x512xf32>,
    return
  }
  func.func @transform_0(%arg0: i32) -> (i32, i32) {
    %c0_i32 = arith.constant 0 : i32
    %c0_i32_0 = arith.constant 0 : i32
    %c0_i32_1 = arith.constant 0 : i32
    return %c0_i32, %c0_i32_0 : i32, i32
  }
  func.func @transform_1(%arg0: i32) -> (i32, i32) {
    %c0_i32 = arith.constant 0 : i32
    %c0_i32_0 = arith.constant 0 : i32
    %c0_i32_1 = arith.constant 0 : i32
    return %c0_i32, %c0_i32_0 : i32, i32
  }
  func.func @transform_2(%arg0: i32) -> (i32, i32) {
    %c0_i32 = arith.constant 0 : i32
    %c0_i32_0 = arith.constant 0 : i32
    return %arg0, %c0_i32 : i32, i32
  }
  func.func @transform_3(%arg0: i32) -> (i32, i32) {
    %c0_i32 = arith.constant 0 : i32
    %c0_i32_0 = arith.constant 0 : i32
    return %arg0, %c0_i32 : i32, i32
  }
}

</mosaic_0001>

<bundles_post_ra>
// kernel: tpu_custom_call.1
= control target key start
LH: loop header
LB: loop body
LE: loop exit
PB: predicated region body
PF: predicated region fallthrough
CT: control target
= control target key end

     0   :  { %8 = vsyncpa [#allocation3], 0  ;;  %s961_s0 = inlined_call_operand.hbm [shape: f32[1,512], index: 0, kind: input, shape index: {}]   ;;  %s962_s1 = inlined_call_operand.hbm [shape: f32[1,512], index: 1, kind: input, shape index: {}]   ;;  %s963_s2 = inlined_call_operand.hbm [shape: f32[40,512], index: 2, kind: input, shape index: {}]   ;;  %s964_s3 = inlined_call_operand.hbm [shape: f32[40,512], index: 3, kind: output, shape index: {}]  }
   0x1   :  { %9 = vsyncpa [#allocation6], 0 }
   0x2   :  { %10 = vsyncpa [#allocation4], 0 }
   0x3   :  { %12 = vsyncpa [#allocation4 + $0x1], 0  ;;  %s710_s12 = smov 0   ;;  %s712_s13 = smov 0  }
   0x4   :  { %s714_s14 = smov 0   ;;  %s716_s15 = smov 0  }
   0x5 LB: > { %s731_s16 = sadd.s32 4294967295, %s680_s15   ;;  %s422_s17 = sadd.s32 4294967294, %s680_s15   ;;  %s680_s15 = sphi %s716_s15, %s986_s15   ;;  %s676_s14 = sphi %s714_s14, %s985_s14   ;;  %s672_s13 = sphi %s712_s13, %s984_s13   ;;  %s668_s12 = sphi %s710_s12, %s983_s12  }
   0x6   : > { %s735_s18 = sadd.s32 1, %s680_s15   ;;  %s67_s19 = sadd.s32 1, %s676_s14 }
   0x7   : > { %s64_s20 = ssub.s32 %s680_s15, %s735_s18  ;;  %p74_p0 = scmp.ne.s32.totalorder %s676_s14, %s672_s13 }
   0x8   : > { %p65_p1 = scmp.eq.s32.totalorder %s64_s20, 0  ;;  %p75_p2 = scmp.eq.s32.totalorder %s680_s15, 0 }
   0x9   : > { %p80_p3 = scmp.ne.s32.totalorder %s672_s13, %s668_s12  ;;  %p965_p4 = scmp.eq.s32.totalorder %s731_s16, 0 }
   0xa   : > { %s747_s21 = scalar_select %p65_p1, %s676_s14, %s67_s19  }
   0xb   : > { %p749_p5 = por %p75_p2, %p74_p0  ;;  %p755_p6 = por %p965_p4, %p80_p3 }
   0xc   : > { %p104_p7 = scmp.eq.s32.totalorder %s731_s16, 2  ;;  %p110_p8 = scmp.eq.s32.totalorder %s422_s17, 2 }
   0xd   : > { %s968_s22 = scalar_select %p749_p5, 1, 0 }
   0xe   : > { %s969_s23 = scalar_select %p755_p6, 1, 0 }
   0xf   : > { %p423_p9 = scmp.ge.s32.totalorder %s680_s15, 1  ;;  %p117_p10 = scmp.lt.s32.totalorder %s680_s15, 4 }
  0x10   : > { %p762_p11 = por %p104_p7, %p74_p0  ;;  %p766_p12 = por %p110_p8, %p80_p3 }
  0x11   : > { %p770_p13 = pnand %p423_p9, %p117_p10  ;;  %s682_s27 = smov [#allocation2]  }
  0x12   : > { %s970_s24 = scalar_select %p762_p11, 1, 0 }
  0x13   : > { %s971_s25 = scalar_select %p766_p12, 1, 0 }
  0x14   : > { %s972_s26 = scalar_select %p770_p13, 1, 0 }
  0x15   : > { %p468_p1 = pneg %p770_p13  ;;  %s130_s28 = sshll.u32 %s682_s27, 4  ;;  %s131_s28 = int_to_ptr.vmem [resolvable:$true] %s130_s28 }
  0x16   : > { %s683_s29 = smov [#allocation5]   ;;  %s522_s7 = scalar_lea.hbm %s961_s0, 64 }
  0x17   : > { %s141_s30 = sshll.u32 %s683_s29, 4  ;;  %p778_p0 = pnand %p468_p1, %p965_p4  ;;  %s782_s30 = int_to_ptr.vmem [resolvable:$true] %s141_s30 }
  0x18   : > { %p523_p2 = scmp.ne.s32.totalorder %s961_s0, %s522_s7  ;;  %p529_p9 = scmp.lt.u32.totalorder %s522_s7, %s961_s0 }
  0x19   : > { %p524_p3 = pneg %p778_p0 }
  0x1b   : > { %p525_p7 = pnand %p524_p3, %p523_p2 }
  0x1d   : > { %p526_p8 = pneg %p525_p7 }
  0x1f   : > { %p531_p10 = pnand %p529_p9, %p526_p8 }
  0x21   : > { %534 = shalt.err (!%p531_p10)
}
  0x22   : > { %s535_s17 = scalar_lea.vmem %s131_s28, 64  ;;  %p543_p11 = scmp.lt.s32.totalorder %s131_s28, %s131_s28 }
  0x23   : > { %p536_p1 = scmp.ne.s32.totalorder %s131_s28, %s535_s17  ;;  %p544_p6 = scmp.lt.s32.totalorder %s535_s17, %s535_s17 }
  0x25   : > { %p538_p4 = pnand %p536_p1, %p524_p3  ;;  %p545_p13 = por %p544_p6, %p543_p11 }
  0x27   : > { %p539_p12 = pneg %p538_p4 }
  0x29   : > { %p546_p5 = pnand %p545_p13, %p539_p12 }
  0x2b   : > { %549 = shalt.err (!%p546_p5)
}
  0x2c   : > { %471 = dma.hbm_to_vmem [thread:$0]  (!%p778_p0), %s961_s0, 64, %s131_s28, [#allocation3]  }
  0x2d   : > { %s550_s5 = scalar_lea.hbm %s962_s1, 64 }
  0x2e   : > { %p551_p4 = scmp.ne.s32.totalorder %s962_s1, %s550_s5  ;;  %p557_p5 = scmp.lt.u32.totalorder %s550_s5, %s962_s1 }
  0x30   : > { %p553_p6 = pnand %p551_p4, %p524_p3 }
  0x32   : > { %p554_p11 = pneg %p553_p6 }
  0x34   : > { %p559_p12 = pnand %p557_p5, %p554_p11 }
  0x36   : > { %562 = shalt.err (!%p559_p12)
}
  0x37   : > { %s563_s28 = scalar_lea.vmem %s782_s30, 64  ;;  %p571_p8 = scmp.lt.s32.totalorder %s782_s30, %s782_s30 }
  0x38   : > { %p564_p13 = scmp.ne.s32.totalorder %s782_s30, %s563_s28  ;;  %p572_p9 = scmp.lt.s32.totalorder %s563_s28, %s563_s28 }
  0x3a   : > { %p566_p2 = pnand %p564_p13, %p524_p3  ;;  %p573_p10 = por %p572_p9, %p571_p8 }
  0x3c   : > { %p567_p7 = pneg %p566_p2 }
  0x3e   : > { %p574_p1 = pnand %p573_p10, %p567_p7 }
  0x40   : > { %577 = shalt.err (!%p574_p1)
}
  0x41   : > { %474 = dma.hbm_to_vmem [thread:$0]  (!%p778_p0), %s962_s1, 64, %s782_s30, [#allocation6]  }
  0x42   : > { %p426_p4 = scmp.ge.s32.totalorder %s680_s15, 3 }
  0x43   : > { %p974_p6 = scmp.ne.s32.totalorder (!%p426_p4), %s968_s22, 0 }
  0x44   : > { %148 = sbr.rel (%p426_p4) target bundleno = 110 (0x6e), region = 24 }
  0x4b   : > { %151 = sbr.rel (!%p974_p6) target bundleno = 110 (0x6e), region = 28  ;;  %s152_s17 = sand.u32 (%p974_p6), 1, %s680_s15  }
  0x4c   : > { %s154_s19 = sand.u32 (%p974_p6), 1, %s676_s14   ;;  %s428_s27 = sshll.u32 (%p974_p6), %s680_s15, 1 }
  0x4d   : > { %s427_s20 = sshll.u32 (%p974_p6), %s154_s19, 6  ;;  %s158_s29 = ssub.s32 (%p974_p6), 5, %s428_s27 }
  0x4e   : > { %p159_p3 = scmp.lt.s32.totalorder (%p974_p6), %s158_s29, 2  ;;  %s840_s5 = scalar_lea.sflag (%p974_p6), [#allocation3], %s152_s17 }
  0x4f   : > { %s156_s6 = scalar_lea.vmem (%p974_p6), [#allocation7], %s427_s20 }
  0x52   : > { %s988_s29 = smov (!%p159_p3, %s158_s29), 2 }
  0x53   : > { %s837_s4 = sshll.u32 %s988_s29, 9 }
  0x54   : > { %s164_s30 = ssub.s32 1024, %s837_s4 }
  0x55   : > { %165 = vsyncadd %s840_s5, %s164_s30  ;;  %p431_p0 = scmp.ne.s32.totalorder %s837_s4, 0  ;;  %s454_s22 = sshll.u32 %s680_s15, 10 }
  0x56   : > { %s848_s9 = scalar_lea.hbm %s963_s2, %s454_s22  ;;  %s171_s28 = sshll.u32 %s156_s6, 4  ;;  %s850_s28 = int_to_ptr.vmem [resolvable:$true] %s171_s28 }
  0x57   : > { %s578_s10 = scalar_lea.hbm %s848_s9, %s837_s4  ;;  %s582_s19 = scalar_lea.hbm %s963_s2, 2560 }
  0x58   : > { %p579_p11 = scmp.ne.s32.totalorder %s848_s9, %s578_s10  ;;  %p583_p13 = scmp.lt.u32.totalorder %s848_s9, %s963_s2 }
  0x59   : > { %p584_p2 = scmp.lt.u32.totalorder %s582_s19, %s578_s10  ;;  %p586_p8 = scmp.lt.u32.totalorder %s578_s10, %s848_s9 }
  0x5a   : > { %p580_p5 = pnand %p579_p11, %p431_p0 }
  0x5b   : > { %p585_p7 = por %p584_p2, %p583_p13 }
  0x5c   : > { %p581_p12 = pneg %p580_p5 }
  0x5d   : > { %p587_p9 = por %p586_p8, %p585_p7 }
  0x5f   : > { %p588_p10 = pnand %p587_p9, %p581_p12 }
  0x61   : > { %591 = shalt.err (!%p588_p10)
}
  0x62   : > { %s592_s29 = scalar_lea.vmem %s850_s28, %s837_s4  ;;  %s684_s30 = smov [#allocation7]  }
  0x63   : > { %p593_p1 = scmp.ne.s32.totalorder %s850_s28, %s592_s29  ;;  %s596_s6 = sshll.u32 %s684_s30, 4  ;;  %s597_s6 = int_to_ptr.vmem [resolvable:$false] %s596_s6 }
  0x64   : > { %s598_s22 = scalar_lea.vmem %s597_s6, 2048  ;;  %p599_p3 = scmp.lt.s32.totalorder %s850_s28, %s597_s6 }
  0x65   : > { %p594_p4 = pnand %p593_p1, %p431_p0  ;;  %p600_p11 = scmp.lt.s32.totalorder %s598_s22, %s592_s29 }
  0x67   : > { %p595_p6 = pneg %p594_p4  ;;  %p601_p5 = por %p600_p11, %p599_p3 }
  0x69   : > { %p602_p13 = pnand %p601_p5, %p595_p6 }
  0x6b   : > { %605 = shalt.err (!%p602_p13)
}
  0x6c   : > { %s685_s7 = smov 512   ;;  %s686_s8 = smov 32  }
  0x6d   : > { %177 = dma.hbm_to_vmem [thread:$0]  (%p431_p0), %s848_s9, %s837_s4, %s850_s28, %s840_s5, %s685_s7, %s685_s7, %s686_s8  }
  0x6e PF: > { %p975_p12 = scmp.ne.s32.totalorder %s972_s26, 0 }
  0x6f   : > { %p976_p2 = scmp.eq.s32.totalorder (!%p975_p12), %s731_s16, 0 }
  0x70   : > { %183 = sbr.rel (%p975_p12) target bundleno = 172 (0xac), region = 32 }
  0x77   : > { %651 = dma.done.wait (%p976_p2), [#allocation3], 64   ;;  %p977_p7 = pmov %p976_p2 }
  0x78   : > { %p978_p8 = pmov %p976_p2 }
  0x79   : > { %653 = vsyncadd (%p977_p7), [#allocation3], 4294967232 }
  0x7a   : > { %655 = dma.done.wait (%p978_p8), [#allocation6], 64   ;;  %p979_p9 = pmov %p976_p2 }
  0x7b   : > { %s193_s4 = sand.u32 1, %s731_s16   ;;  %s195_s5 = sand.u32 1, %s672_s13  }
  0x7c   : > { %657 = vsyncadd (%p979_p9), [#allocation6], 4294967232  ;;  %s891_s26 = sshll.u32 %s195_s5, 6  ;;  %s194_s9 = scalar_lea.sflag [#allocation3], %s193_s4 }
  0x7d   : > { %s197_s28 = scalar_lea.vmem [#allocation7], %s891_s26  ;;  %p980_p0 = scmp.ne.s32.totalorder %s969_s23, 0 }
  0x7f   : > { %659 = dma.done.wait (%p980_p0), %s194_s9, 1024  }
  0x80   : > { %661 = vsyncadd (%p980_p0), %s194_s9, 4294966272  ;;  %v243_v0 = vlaneseq  ;;  %v232_v6 = vld [vmem:[%s197_s28] sm:$0xff]  ;;  %v240_v7 = vld [vmem:[#allocation2] sm:$0xf]  ;;  %s219_s23 = scalar_lea.vmem [#allocation8], %s891_s26  ;;  %s901_s10 = scalar_lea.sflag [#allocation4], %s195_s5 }
  0x81   : > { %v241_v8 = vld [vmem:[#allocation5] sm:$0xf]  ;;  %v233_v11 = vld [vmem:[%s197_s28 + $0x8] sm:$0xff]  ;;  %v234_v14 = vld [vmem:[%s197_s28 + $0x10] sm:$0xff]  ;;  %p981_p10 = scmp.ne.s32.totalorder %s970_s24, 0 }
  0x82   : > { %v244_v1 = vshrl.u32 %v243_v0, 7  ;;  %v235_v15 = vld [vmem:[%s197_s28 + $0x18] sm:$0xff]  ;;  %v236_v20 = vld [vmem:[%s197_s28 + $0x20] sm:$0xff]  ;;  %v237_v21 = vld [vmem:[%s197_s28 + $0x28] sm:$0xff]  ;;  %s442_s11 = sshll.u32 (%p981_p10), %s731_s16, 1 }
  0x83   : > { %v238_v22 = vld [vmem:[%s197_s28 + $0x30] sm:$0xff]  ;;  %v239_v27 = vld [vmem:[%s197_s28 + $0x38] sm:$0xff]  ;;  %s317_s17 = ssub.s32 (%p981_p10), 5, %s442_s11 }
  0x84   : > { %v245_v2 = vsub.s32 0, %v244_v1  ;;  %v249_v3 = vsub.s32 1, %v244_v1  ;;  %v253_v4 = vsub.s32 2, %v244_v1  ;;  %v257_v5 = vsub.s32 3, %v244_v1  ;;  %p318_p1 = scmp.lt.s32.totalorder (%p981_p10), %s317_s17, 2 }
  0x86   : > { %v246_v9 = vrot.slane %v241_v8, %v245_v2  ;;  %v275_v10 = vrot.slane %v240_v7, %v245_v2  ;;  %v250_v12 = vrot.slane %v241_v8, %v249_v3  ;;  %v279_v13 = vrot.slane %v240_v7, %v249_v3 }
  0x87   : > { %v254_v16 = vrot.slane %v241_v8, %v253_v4  ;;  %v283_v17 = vrot.slane %v240_v7, %v253_v4  ;;  %v258_v18 = vrot.slane %v241_v8, %v257_v5  ;;  %v287_v19 = vrot.slane %v240_v7, %v257_v5 }
  0x88   : > { %v263_v23 = vadd.f32 %v246_v9, %v232_v6  ;;  %v264_v24 = vadd.f32 %v250_v12, %v233_v11  ;;  %v267_v25 = vadd.f32 %v246_v9, %v236_v20  ;;  %v268_v26 = vadd.f32 %v250_v12, %v237_v21 }
  0x89   : > { %v265_v28 = vadd.f32 %v254_v16, %v234_v14  ;;  %v266_v29 = vadd.f32 %v258_v18, %v235_v15  ;;  %v269_v30 = vadd.f32 %v254_v16, %v238_v22  ;;  %v270_v31 = vadd.f32 %v258_v18, %v239_v27  ;;  %315 = sbr.rel (!%p981_p10) target bundleno = 172 (0xac), region = 48 }
  0x8a   : > { %v292_v32 = vmul.f32 %v275_v10, %v263_v23  ;;  %v293_v33 = vmul.f32 %v279_v13, %v264_v24  ;;  %v296_v34 = vmul.f32 %v275_v10, %v267_v25  ;;  %v297_v35 = vmul.f32 %v279_v13, %v268_v26 }
  0x8b   : > { %v294_v36 = vmul.f32 %v283_v17, %v265_v28  ;;  %v295_v37 = vmul.f32 %v287_v19, %v266_v29  ;;  %v298_v38 = vmul.f32 %v283_v17, %v269_v30  ;;  %v299_v39 = vmul.f32 %v287_v19, %v270_v31 }
  0x8c   : > { %300 = vst [vmem:[%s219_s23] sm:$0xff] %v292_v32  ;;  %301 = vst [vmem:[%s219_s23 + $0x8] sm:$0xff] %v293_v33 }
  0x8d   : > { %304 = vst [vmem:[%s219_s23 + $0x20] sm:$0xff] %v296_v34  ;;  %305 = vst [vmem:[%s219_s23 + $0x28] sm:$0xff] %v297_v35 }
  0x8e   : > { %302 = vst [vmem:[%s219_s23 + $0x10] sm:$0xff] %v294_v36  ;;  %303 = vst [vmem:[%s219_s23 + $0x18] sm:$0xff] %v295_v37 }
  0x8f   : > { %306 = vst [vmem:[%s219_s23 + $0x30] sm:$0xff] %v298_v38  ;;  %307 = vst [vmem:[%s219_s23 + $0x38] sm:$0xff] %v299_v39 }
  0x90   : > { %s990_s17 = smov (!%p318_p1, %s317_s17), 2 }
  0x91   : > { %s906_s19 = sshll.u32 %s990_s17, 9 }
  0x92   : > { %s323_s20 = ssub.s32 1024, %s906_s19 }
  0x93   : > { %324 = vsyncadd %s901_s10, %s323_s20  ;;  %p445_p4 = scmp.ne.s32.totalorder %s906_s19, 0  ;;  %s457_s27 = sshll.u32 %s731_s16, 10 }
  0x94   : > { %s915_s30 = scalar_lea.hbm %s964_s3, %s457_s27  ;;  %s330_s6 = sshll.u32 %s219_s23, 4  ;;  %s917_s6 = int_to_ptr.vmem [resolvable:$true] %s330_s6 }
  0x95   : > { %s606_s22 = scalar_lea.vmem %s917_s6, %s906_s19  ;;  %s687_s7 = smov [#allocation8]  }
  0x96   : > { %p607_p6 = scmp.ne.s32.totalorder %s917_s6, %s606_s22  ;;  %s610_s8 = sshll.u32 %s687_s7, 4  ;;  %s611_s8 = int_to_ptr.vmem [resolvable:$false] %s610_s8 }
  0x97   : > { %s612_s16 = scalar_lea.vmem %s611_s8, 2048  ;;  %p613_p5 = scmp.lt.s32.totalorder %s917_s6, %s611_s8 }
  0x98   : > { %p608_p3 = pnand %p607_p6, %p445_p4  ;;  %p614_p13 = scmp.lt.s32.totalorder %s612_s16, %s606_s22 }
  0x9a   : > { %p609_p11 = pneg %p608_p3  ;;  %p615_p12 = por %p614_p13, %p613_p5 }
  0x9c   : > { %p616_p2 = pnand %p615_p12, %p609_p11 }
  0x9e   : > { %619 = shalt.err (!%p616_p2)
}
  0x9f   : > { %s620_s4 = scalar_lea.hbm %s915_s30, %s906_s19  ;;  %s624_s9 = scalar_lea.hbm %s964_s3, 2560 }
  0xa0   : > { %p621_p7 = scmp.ne.s32.totalorder %s915_s30, %s620_s4  ;;  %p625_p0 = scmp.lt.u32.totalorder %s915_s30, %s964_s3 }
  0xa1   : > { %p626_p10 = scmp.lt.u32.totalorder %s624_s9, %s620_s4  ;;  %p628_p6 = scmp.lt.u32.totalorder %s620_s4, %s915_s30 }
  0xa2   : > { %p622_p8 = pnand %p621_p7, %p445_p4 }
  0xa3   : > { %p627_p1 = por %p626_p10, %p625_p0 }
  0xa4   : > { %p623_p9 = pneg %p622_p8 }
  0xa5   : > { %p629_p3 = por %p628_p6, %p627_p1 }
  0xa7   : > { %p630_p11 = pnand %p629_p3, %p623_p9 }
  0xa9   : > { %633 = shalt.err (!%p630_p11)
}
  0xaa   : > { %s688_s11 = smov 512   ;;  %s689_s17 = smov 32  }
  0xab   : > { %336 = dma.vmem_to_hbm [thread:$0]  (%p445_p4), %s917_s6, %s906_s19, %s915_s30, %s901_s10, %s688_s11, %s688_s11, %s689_s17  }
  0xac PF: > { %p483_p5 = scmp.ge.s32.totalorder %s680_s15, 2  ;;  %s345_s20 = sand.u32 1, %s668_s12  }
  0xad   : > { %p982_p13 = scmp.ne.s32.totalorder %s971_s25, 0  ;;  %s346_s27 = scalar_lea.sflag [#allocation4], %s345_s20 }
  0xaf   : > { %p476_p12 = pnand %p483_p5, %p982_p13 }
  0xb1   : > { %663 = dma.done.wait (!%p476_p12), %s346_s27, 1024  }
  0xb2   : > { %665 = vsyncadd (!%p476_p12), %s346_s27, 4294966272  ;;  %p15_p2 = scmp.ge.s32.totalorder %s735_s18, 5   ;;  %s983_s12 = smov %s672_s13 }
  0xb3   : > { %s984_s13 = smov %s676_s14  ;;  %s985_s14 = smov %s747_s21 }
  0xb4   : > { %s986_s15 = smov %s735_s18  ;;  %17 = sbr.rel (!%p15_p2) target bundleno = 5 (0x5), region = 84 }
  0xbb   :  { %351 = vsyncpa [#allocation3], 1 }
  0xbc   :  { %353 = vsyncpa [#allocation3 + $0x1], 1 }
  0xbd   :  { %354 = vsyncpa [#allocation6], 1 }
  0xbe   :  { %355 = vsyncpa [#allocation4], 1 }
  0xbf   :  { %357 = vsyncpa [#allocation4 + $0x1], 1 }

</bundles_post_ra>
